<compile_context>
chip_gen: v6e
topology: v6e:2x2x1
jax: 0.10.0
libtpu: 0.0.40
codegen_flags: <defaults>
</compile_context>

<pallas_src>
import functools

import jax
import jax.numpy as jnp
from jax.experimental import pallas as pl
from jax.experimental.pallas import tpu as pltpu

STATE_DIM = 7
ACTION_DIM = 3
HIDDEN = 64
PAD_IN = 8      # pad K of fc1 7 -> 8
PAD_OUT = 128   # pad N of fc_out 3 -> 128 (lane-dense output)


def _round_up(x, m):
    return (x + m - 1) // m * m


def actor_kernel(x_ref, w1_ref, b1_ref, w2_ref, b2_ref, w3_ref, b3_ref, out_ref):
    # One batch tile per grid step.  Weights are VMEM-resident across steps
    # (constant index maps).  Dot operands are bf16, accumulation is f32,
    # all post-matmul VPU work (bias add / ReLU / store) is f32.
    x = x_ref[...]
    h1 = jnp.dot(x, w1_ref[...], preferred_element_type=jnp.float32) + b1_ref[...]
    h1 = jnp.maximum(h1, 0.0)
    h2 = jnp.dot(h1.astype(w2_ref.dtype), w2_ref[...],
                 preferred_element_type=jnp.float32) + b2_ref[...]
    h2 = jnp.maximum(h2, 0.0)
    logits = jnp.dot(h2.astype(w3_ref.dtype), w3_ref[...],
                     preferred_element_type=jnp.float32) + b3_ref[...]
    out_ref[...] = logits.astype(out_ref.dtype)


def prepare_params(raw):
    """PyTorch-style params (W: (out, in) f32, b: (out,) f32) -> kernel layout:
    transposed to (in, out), K/N padded, matmul operands cast to bf16."""
    w1 = jnp.pad(raw["w1"].T, ((0, PAD_IN - STATE_DIM), (0, 0)))      # (8, 64)
    w2 = raw["w2"].T                                                   # (64, 64)
    w3 = jnp.pad(raw["w3"].T, ((0, 0), (0, PAD_OUT - ACTION_DIM)))     # (64, 128)
    b3 = jnp.pad(raw["b3"], ((0, PAD_OUT - ACTION_DIM),))              # (128,)
    return {
        "w1": w1.astype(jnp.bfloat16),
        "b1": raw["b1"].reshape(1, HIDDEN).astype(jnp.float32),
        "w2": w2.astype(jnp.bfloat16),
        "b2": raw["b2"].reshape(1, HIDDEN).astype(jnp.float32),
        "w3": w3.astype(jnp.bfloat16),
        "b3": b3.reshape(1, PAD_OUT).astype(jnp.float32),
    }


@functools.partial(jax.jit, static_argnames=("tile_b",))
def actor_forward(x, kparams, tile_b=512):
    """x: (B, STATE_DIM) f32.  kparams: output of prepare_params.
    Returns logits (B, ACTION_DIM) f32."""
    B = x.shape[0]
    TB = min(tile_b, _round_up(B, 8))        # batch tile (sublane multiple of 8)
    B_pad = _round_up(B, TB)
    # Pad features 7 -> 8 and batch to a tile multiple; matmul input in bf16.
    x_p = jnp.pad(x, ((0, B_pad - B), (0, PAD_IN - STATE_DIM))).astype(jnp.bfloat16)

    w1, b1 = kparams["w1"], kparams["b1"]
    w2, b2 = kparams["w2"], kparams["b2"]
    w3, b3 = kparams["w3"], kparams["b3"]

    const = lambda shape: pl.BlockSpec(shape, lambda i: (0, 0))  # resident across tiles

    out_padded = pl.pallas_call(
        actor_kernel,
        out_shape=jax.ShapeDtypeStruct((B_pad, PAD_OUT), jnp.float32),
        grid=(B_pad // TB,),
        in_specs=[
            pl.BlockSpec((TB, PAD_IN), lambda i: (i, 0)),   # x streams over batch
            const((PAD_IN, HIDDEN)), const((1, HIDDEN)),    # w1, b1
            const((HIDDEN, HIDDEN)), const((1, HIDDEN)),    # w2, b2
            const((HIDDEN, PAD_OUT)), const((1, PAD_OUT)),  # w3, b3
        ],
        out_specs=pl.BlockSpec((TB, PAD_OUT), lambda i: (i, 0)),  # lane-dense (128)
        compiler_params=pltpu.CompilerParams(
            dimension_semantics=("parallel",)),  # shard batch tiles across TCs
    )(x_p, w1, b1, w2, b2, w3, b3)

    return out_padded[:B, :ACTION_DIM]


def init_raw_params(key):
    """nn.Linear default init: U(-1/sqrt(fan_in), 1/sqrt(fan_in)), (out, in) layout."""
    ks = jax.random.split(key, 6)

    def linear(kw, kb, fan_in, fan_out):
        bound = 1.0 / jnp.sqrt(fan_in)
        w = jax.random.uniform(kw, (fan_out, fan_in), jnp.float32, -bound, bound)
        b = jax.random.uniform(kb, (fan_out,), jnp.float32, -bound, bound)
        return w, b

    w1, b1 = linear(ks[0], ks[1], STATE_DIM, HIDDEN)
    w2, b2 = linear(ks[2], ks[3], HIDDEN, HIDDEN)
    w3, b3 = linear(ks[4], ks[5], HIDDEN, ACTION_DIM)
    return {"w1": w1, "b1": b1, "w2": w2, "b2": b2, "w3": w3, "b3": b3}


def reference_forward(x, raw):
    # Plain-JAX f32 reference, same math as the PyTorch forward.
    h1 = jnp.maximum(x @ raw["w1"].T + raw["b1"], 0.0)
    h2 = jnp.maximum(h1 @ raw["w2"].T + raw["b2"], 0.0)
    return h2 @ raw["w3"].T + raw["b3"]


if __name__ == "__main__":
    key = jax.random.PRNGKey(0)
    kparam, kx1, kx2 = jax.random.split(key, 3)
    raw = init_raw_params(kparam)
    kparams = prepare_params(raw)

    # Small batch (single tile) and a non-multiple-of-tile batch (exercises
    # batch padding + multi-tile parallel grid).
    for B, kx in ((8, kx1), (1000, kx2)):
        x = jax.random.normal(kx, (B, STATE_DIM), dtype=jnp.float32)
        logits = jax.block_until_ready(actor_forward(x, kparams))
        ref = reference_forward(x, raw)
        assert logits.shape == (B, ACTION_DIM)
        # bf16 matmul operands with f32 accumulation -> loosened tolerance.
        err = jnp.max(jnp.abs(logits - ref))
        assert jnp.allclose(logits, ref, atol=5e-2, rtol=5e-2), f"B={B} max err {err}"

    print("KERNEL_OK")
</pallas_src>

<mosaic_0001>
module attributes {stable_mosaic.version = 11 : i64} {
  func.func @actor_kernel(%arg0: i32, %arg1: memref<8x8xbf16, #tpu.memory_space<vmem>>, %arg2: memref<8x64xbf16, #tpu.memory_space<vmem>>, %arg3: memref<1x64xf32, #tpu.memory_space<vmem>>, %arg4: memref<64x64xbf16, #tpu.memory_space<vmem>>, %arg5: memref<1x64xf32, #tpu.memory_space<vmem>>, %arg6: memref<64x128xbf16, #tpu.memory_space<vmem>>, %arg7: memref<1x128xf32, #tpu.memory_space<vmem>>, %arg8: memref<8x128xf32, #tpu.memory_space<vmem>>) attributes {dimension_semantics = [#tpu.dimension_semantics<parallel>], iteration_bounds = array<i64: 1>, scalar_prefetch = 0 : i64, scratch_operands = 0 : i64, tpu.core_type = #tpu.core_type<tc>, window_params = [{transform_indices = @transform_0, window_bounds = array<i64: 8, 8>}, {pipeline_mode = #tpu.pipeline_mode<synchronous>, transform_indices = @transform_1, window_bounds = array<i64: 8, 64>}, {pipeline_mode = #tpu.pipeline_mode<synchronous>, transform_indices = @transform_2, window_bounds = array<i64: 1, 64>}, {pipeline_mode = #tpu.pipeline_mode<synchronous>, transform_indices = @transform_3, window_bounds = array<i64: 64, 64>}, {pipeline_mode = #tpu.pipeline_mode<synchronous>, transform_indices = @transform_4, window_bounds = array<i64: 1, 64>}, {pipeline_mode = #tpu.pipeline_mode<synchronous>, transform_indices = @transform_5, window_bounds = array<i64: 64, 128>}, {pipeline_mode = #tpu.pipeline_mode<synchronous>, transform_indices = @transform_6, window_bounds = array<i64: 1, 128>}, {transform_indices = @transform_7, window_bounds = array<i64: 8, 128>}]} {
    %c0 = arith.constant 0 : index
    %c0_0 = arith.constant 0 : index
    %0 = vector.load %arg1[%c0, %c0_0] : memref<8x8xbf16, #tpu.memory_space<vmem>>, vector<8x8xbf16>
    %c0_1 = arith.constant 0 : index
    %c0_2 = arith.constant 0 : index
    %1 = vector.load %arg2[%c0_1, %c0_2] : memref<8x64xbf16, #tpu.memory_space<vmem>>, vector<8x64xbf16>
    %cst = arith.constant dense<0.000000e+00> : vector<8x64xf32>
    %2 = tpu.matmul %0, %1, %cst {dimension_numbers = #tpu.dot_dimension_numbers<[1], [0], [0], [1], [0, 0, 1, 1], [], []>} : vector<8x8xbf16>, vector<8x64xbf16>, vector<8x64xf32> -> vector<8x64xf32>
    %c0_3 = arith.constant 0 : index
    %c0_4 = arith.constant 0 : index
    %3 = vector.load %arg3[%c0_3, %c0_4] : memref<1x64xf32, #tpu.memory_space<vmem>>, vector<1x64xf32>
    %4 = vector.broadcast %3 : vector<1x64xf32> to vector<8x64xf32>
    %5 = arith.addf %2, %4 : vector<8x64xf32>
    %cst_5 = arith.constant 0.000000e+00 : f32
    %6 = vector.broadcast %cst_5 : f32 to vector<8x64xf32>
    %7 = arith.maximumf %5, %6 : vector<8x64xf32>
    %8 = arith.truncf %7 : vector<8x64xf32> to vector<8x64xbf16>
    %c0_6 = arith.constant 0 : index
    %c0_7 = arith.constant 0 : index
    %9 = vector.load %arg4[%c0_6, %c0_7] : memref<64x64xbf16, #tpu.memory_space<vmem>>, vector<64x64xbf16>
    %cst_8 = arith.constant dense<0.000000e+00> : vector<8x64xf32>
    %10 = tpu.matmul %8, %9, %cst_8 {dimension_numbers = #tpu.dot_dimension_numbers<[1], [0], [0], [1], [0, 0, 1, 1], [], []>} : vector<8x64xbf16>, vector<64x64xbf16>, vector<8x64xf32> -> vector<8x64xf32>
    %c0_9 = arith.constant 0 : index
    %c0_10 = arith.constant 0 : index
    %11 = vector.load %arg5[%c0_9, %c0_10] : memref<1x64xf32, #tpu.memory_space<vmem>>, vector<1x64xf32>
    %12 = vector.broadcast %11 : vector<1x64xf32> to vector<8x64xf32>
    %13 = arith.addf %10, %12 : vector<8x64xf32>
    %cst_11 = arith.constant 0.000000e+00 : f32
    %14 = vector.broadcast %cst_11 : f32 to vector<8x64xf32>
    %15 = arith.maximumf %13, %14 : vector<8x64xf32>
    %16 = arith.truncf %15 : vector<8x64xf32> to vector<8x64xbf16>
    %c0_12 = arith.constant 0 : index
    %c0_13 = arith.constant 0 : index
    %17 = vector.load %arg6[%c0_12, %c0_13] : memref<64x128xbf16, #tpu.memory_space<vmem>>, vector<64x128xbf16>
    %cst_14 = arith.constant dense<0.000000e+00> : vector<8x128xf32>
    %18 = tpu.matmul %16, %17, %cst_14 {dimension_numbers = #tpu.dot_dimension_numbers<[1], [0], [0], [1], [0, 0, 1, 1], [], []>} : vector<8x64xbf16>, vector<64x128xbf16>, vector<8x128xf32> -> vector<8x128xf32>
    %c0_15 = arith.constant 0 : index
    %c0_16 = arith.constant 0 : index
    %19 = vector.load %arg7[%c0_15, %c0_16] : memref<1x128xf32, #tpu.memory_space<vmem>>, vector<1x128xf32>
    %20 = vector.broadcast %19 : vector<1x128xf32> to vector<8x128xf32>
    %21 = arith.addf %18, %20 : vector<8x128xf32>
    %c0_17 = arith.constant 0 : index
    %c0_18 = arith.constant 0 : index
    %22 = vector.load %arg8[%c0_17, %c0_18] : memref<8x128xf32, #tpu.memory_space<vmem>>, vector<8x128xf32>
    tpu.vector_store %arg8[%c0_17, %c0_18], %21 {strides = array<i32>} : memref<8x128xf32, #tpu.memory_space<vmem>>, vector<8x128xf32>,
    return
  }
  func.func @transform_0(%arg0: i32) -> (i32, i32) {
    %c0_i32 = arith.constant 0 : i32
    %c0_i32_0 = arith.constant 0 : i32
    return %arg0, %c0_i32 : i32, i32
  }
  func.func @transform_1(%arg0: i32) -> (i32, i32) {
    %c0_i32 = arith.constant 0 : i32
    %c0_i32_0 = arith.constant 0 : i32
    %c0_i32_1 = arith.constant 0 : i32
    return %c0_i32, %c0_i32_0 : i32, i32
  }
  func.func @transform_2(%arg0: i32) -> (i32, i32) {
    %c0_i32 = arith.constant 0 : i32
    %c0_i32_0 = arith.constant 0 : i32
    %c0_i32_1 = arith.constant 0 : i32
    return %c0_i32, %c0_i32_0 : i32, i32
  }
  func.func @transform_3(%arg0: i32) -> (i32, i32) {
    %c0_i32 = arith.constant 0 : i32
    %c0_i32_0 = arith.constant 0 : i32
    %c0_i32_1 = arith.constant 0 : i32
    return %c0_i32, %c0_i32_0 : i32, i32
  }
  func.func @transform_4(%arg0: i32) -> (i32, i32) {
    %c0_i32 = arith.constant 0 : i32
    %c0_i32_0 = arith.constant 0 : i32
    %c0_i32_1 = arith.constant 0 : i32
    return %c0_i32, %c0_i32_0 : i32, i32
  }
  func.func @transform_5(%arg0: i32) -> (i32, i32) {
    %c0_i32 = arith.constant 0 : i32
    %c0_i32_0 = arith.constant 0 : i32
    %c0_i32_1 = arith.constant 0 : i32
    return %c0_i32, %c0_i32_0 : i32, i32
  }
  func.func @transform_6(%arg0: i32) -> (i32, i32) {
    %c0_i32 = arith.constant 0 : i32
    %c0_i32_0 = arith.constant 0 : i32
    %c0_i32_1 = arith.constant 0 : i32
    return %c0_i32, %c0_i32_0 : i32, i32
  }
  func.func @transform_7(%arg0: i32) -> (i32, i32) {
    %c0_i32 = arith.constant 0 : i32
    %c0_i32_0 = arith.constant 0 : i32
    return %arg0, %c0_i32 : i32, i32
  }
}

</mosaic_0001>

<bundles_post_ra>
// kernel: actor_forward.1
= control target key start
LH: loop header
LB: loop body
LE: loop exit
PB: predicated region body
PF: predicated region fallthrough
CT: control target
= control target key end

     0   :  { %12 = vsyncpa [#allocation3], 0  ;;  %s477_s0 = inlined_call_operand.vmem [shape: bf16[8,8], index: 0, kind: input, shape index: {}]   ;;  %s478_s1 = inlined_call_operand.vmem [shape: bf16[8,64], index: 1, kind: input, shape index: {}]   ;;  %s479_s2 = inlined_call_operand.vmem [shape: f32[1,64], index: 2, kind: input, shape index: {}]   ;;  %s480_s3 = inlined_call_operand.hbm [shape: bf16[64,64], index: 3, kind: input, shape index: {}]   ;;  %s481_s4 = inlined_call_operand.vmem [shape: f32[1,64], index: 4, kind: input, shape index: {}]   ;;  %s482_s5 = inlined_call_operand.hbm [shape: bf16[64,128], index: 5, kind: input, shape index: {}]   ;;  %s483_s6 = inlined_call_operand.vmem [shape: f32[1,128], index: 6, kind: input, shape index: {}]   ;;  %s484_s7 = inlined_call_operand.vmem [shape: f32[8,128], index: 7, kind: output, shape index: {}]  }
   0x1   :  { %13 = vsyncpa [#allocation5], 0  ;;  %s402_s24 = smov [#allocation2]  }
   0x2   :  { %s25_s25 = sshll.u32 %s402_s24, 4  ;;  %s26_s25 = int_to_ptr.vmem [resolvable:$true] %s25_s25 }
   0x3   :  { %s366_s26 = scalar_lea.vmem %s26_s25, 512  ;;  %p371_p1 = scmp.lt.s32.totalorder %s26_s25, %s26_s25 }
   0x4   :  { %p367_p0 = scmp.ne.s32.totalorder %s26_s25, %s366_s26  ;;  %p372_p2 = scmp.lt.s32.totalorder %s366_s26, %s366_s26 }
   0x6   :  { %p373_p3 = por %p372_p2, %p371_p1 }
   0x8   :  { %p374_p4 = pnand %p373_p3, %p367_p0 }
   0xa   :  { %377 = shalt.err (!%p374_p4)
}
   0xb   :  { %s403_s27 = smov 64   ;;  %s404_s28 = smov 4  }
   0xc   :  { %31 = dma.hbm_to_vmem [thread:$0]  %s480_s3, 512, %s26_s25, [#allocation3], %s403_s27, %s403_s27, %s404_s28  }
   0xd   :  { %s405_s8 = smov [#allocation4]  }
   0xe   :  { %s39_s9 = sshll.u32 %s405_s8, 4  ;;  %s40_s9 = int_to_ptr.vmem [resolvable:$true] %s39_s9 }
   0xf   :  { %s386_s10 = scalar_lea.vmem %s40_s9, 512  ;;  %p391_p6 = scmp.lt.s32.totalorder %s40_s9, %s40_s9 }
  0x10   :  { %p387_p5 = scmp.ne.s32.totalorder %s40_s9, %s386_s10  ;;  %p392_p7 = scmp.lt.s32.totalorder %s386_s10, %s386_s10 }
  0x12   :  { %p393_p8 = por %p392_p7, %p391_p6 }
  0x14   :  { %p394_p9 = pnand %p393_p8, %p387_p5 }
  0x16   :  { %397 = shalt.err (!%p394_p9)
}
  0x17   :  { %45 = dma.hbm_to_vmem [thread:$0]  %s482_s5, 512, %s40_s9, [#allocation5], %s403_s27, %s403_s27, %s404_s28  }
  0x18   :  { %398 = dma.done.wait [#allocation3], 512  }
  0x19   :  { %399 = vsyncadd [#allocation3], 4294966784 }
  0x1a   :  { %400 = dma.done.wait [#allocation5], 512  }
  0x1b   :  { %401 = vsyncadd [#allocation5], 4294966784  ;;  %v406_v0 = vmov 0.0   ;;  %vm407_vm0 = vmmov 0   ;;  %vm68_vm1 = vcmask 1043456   ;;  %v350_v3 = vld [vmem:[#allocation2 + $0x18] sm:$0xff]  }
  0x1c   :  { %314 = vmatprep.subr.bf16.mxu0 %v406_v0  ;;  %316 = vmatprep.mubr.msk.bf16.mxu0 %vm407_vm0, %v406_v0  ;;  %v56_v1 = vld [vmem:[%s478_s1] sm:$0xf]  ;;  %vm64_vm2 = vcmask 64512   ;;  %v351_v5 = vld [vmem:[#allocation2 + $0x10] sm:$0xff]   ;;  %v352_v6 = vld [vmem:[#allocation2 + $0x8] sm:$0xff]   ;;  %vm153_vm3 = vcmask 523264  }
  0x1d   :  { %320 = vmatprep.subr.bf16.mxu1 %v406_v0  ;;  %328 = vmatprep.mubr.msk.bf16.mxu1 %vm407_vm0, %v406_v0  ;;  %v70_v2 = vsel %vm68_vm1, %v56_v1, 0  ;;  %v55_v4 = vld [vmem:[%s477_s0] sm:$0xf]  ;;  %v354_v8 = vld [vmem:[#allocation4 + $0x18] sm:$0xff]   ;;  %v355_v9 = vld [vmem:[#allocation4 + $0x10] sm:$0xff]  }
  0x1e   :  { %315 = vmatpush3.bf16.msra.mxu0 %v70_v2  ;;  %321 = vmatpush3.bf16.msra.mxu1 %v350_v3  ;;  %v353_v7 = vld [vmem:[#allocation2] sm:$0xff]   ;;  %v356_v18 = vld [vmem:[#allocation4 + $0x8] sm:$0xff]  }
  0x1f   :  { %332 = vmatprep.subr.bf16.mxu0 %v406_v0  ;;  %322 = vmatprep.subr.bf16.mxu1 %v406_v0  ;;  %v288_v10 = vld [vmem:[%s479_s2] ss:$0 sm:$0xff] }
  0x20   :  { %v357_v19 = vld [vmem:[#allocation4] sm:$0xff]  }
  0x21   :  { %317 = vmatmul.mubr.msk.bf16.vlgmr.msra.gmra.mxu0 %vm64_vm2, %v55_v4  ;;  %v290_v20 = vld [vmem:[%s481_s4] ss:$0 sm:$0xff] }
  0x22   :  { %340 = vmatprep.mubr.msk.bf16.mxu0 %vm407_vm0, %v406_v0  ;;  %323 = vmatpush3.bf16.msra.mxu1 %v351_v5  ;;  %v296_v28 = vld [vmem:[%s483_s6] ss:$0 sm:$0xff] }
  0x23   :  { %324 = vmatprep.subr.bf16.mxu1 %v406_v0  ;;  %333 = vmatpush3.bf16.msra.mxu0 %v354_v8 }
  0x24   :  { %334 = vmatprep.subr.bf16.mxu0 %v406_v0 }
  0x26   :  { %325 = vmatpush3.bf16.msra.mxu1 %v352_v6 }
  0x27   :  { %326 = vmatprep.subr.bf16.mxu1 %v406_v0  ;;  %335 = vmatpush3.bf16.msra.mxu0 %v355_v9 }
  0x28   :  { %336 = vmatprep.subr.bf16.mxu0 %v406_v0 }
  0x2a   :  { %327 = vmatpush3.bf16.msra.mxu1 %v353_v7 }
  0x2b   :  { %337 = vmatpush3.bf16.msra.mxu0 %v356_v18 }
  0x2c   :  { %338 = vmatprep.subr.bf16.mxu0 %v406_v0 }
  0x2f   :  { %339 = vmatpush3.bf16.msra.mxu0 %v357_v19 }
  0xe1   :  { %v106_v11 = vpop.f32.mrf.mxu0 }
  0xe2   :  { %v107_v12 = vadd.f32 %v288_v10, %v106_v11 }
  0xe3   :  { %v318_v13 = vpop.f32.mrf.mxu0 }
  0xe4   :  { %v112_v14 = vmax.f32 %v107_v12, 0.0 }
  0xe5   :  { %v109_v15 = vpop.f32.mrf.mxu0 }
  0xe6   :  { %v113_v16 = vpack.c.bf16 %v112_v14, %v112_v14 }
  0xe7   :  { %v319_v17 = vpop.f32.mrf.mxu0 }
  0xe8   :  { %329 = vmatmul.mubr.msk.bf16.vlgmr.msra.gmra.mxu1 %vm153_vm3, %v113_v16 }
 0x1a8   :  { %v191_v21 = vpop.f32.mrf.mxu1 }
 0x1a9   :  { %v192_v22 = vadd.f32 %v290_v20, %v191_v21 }
 0x1aa   :  { %v330_v23 = vpop.f32.mrf.mxu1 }
 0x1ab   :  { %v197_v24 = vmax.f32 %v192_v22, 0.0 }
 0x1ac   :  { %v194_v25 = vpop.f32.mrf.mxu1 }
 0x1ad   :  { %v198_v26 = vpack.c.bf16 %v197_v24, %v197_v24 }
 0x1ae   :  { %v331_v27 = vpop.f32.mrf.mxu1 }
 0x1af   :  { %341 = vmatmul.mubr.msk.bf16.vlgmr.msra.gmra.mxu0 %vm153_vm3, %v198_v26 }
 0x26f   :  { %v275_v29 = vpop.f32.mrf.mxu0 }
 0x270   :  { %v276_v30 = vadd.f32 %v296_v28, %v275_v29 }
 0x271   :  { %v342_v31 = vpop.f32.mrf.mxu0 }
 0x272   :  { %281 = vst [vmem:[%s484_s7] sm:$0xff] %v276_v30 }
 0x273   :  { %v278_v32 = vpop.f32.mrf.mxu0 }
 0x275   :  { %v343_v33 = vpop.f32.mrf.mxu0 }
 0x276   :  { %286 = vsyncpa [#allocation3], 1 }
 0x277   :  { %287 = vsyncpa [#allocation5], 1 }

</bundles_post_ra>
